<compile_context>
chip_gen: v6e
topology: v6e:2x2x1
jax: 0.10.0
libtpu: 0.0.40
codegen_flags: <defaults>
</compile_context>

<pallas_src>
import jax
import jax.numpy as jnp
from jax.experimental import pallas as pl
from jax.experimental.pallas import tpu as pltpu


def _round_up(n: int, m: int) -> int:
    return ((n + m - 1) // m) * m


def _device_kind() -> str:
    try:
        return jax.devices()[0].device_kind.lower()
    except Exception:
        return ""


def fcnn_kernel(x_ref,
                w1_ref, b1_ref,
                w2_ref, b2_ref,
                w3_ref, b3_ref,
                w4_ref, b4_ref,
                o_ref):
    """Fused hot path: 4 MXU matmuls + 3 tanh, all operands VMEM-resident.

    Layout: activations are (features, batch_tile) so the batch occupies the
    128-lane axis (lane-dense MXU / VPU / EUP work and lane-dense stores).
    Matmuls accumulate in f32 (preferred_element_type); bias-add and tanh run
    in the bias dtype (bf16 on v6e/v7x, f32 on v5e / f32-debug mode);
    activations are cast back to the weight dtype only to feed the next dot.
    """
    x = x_ref[...]
    h = jnp.tanh(jnp.dot(w1_ref[...], x,
                         preferred_element_type=jnp.float32)
                 .astype(b1_ref.dtype) + b1_ref[...])
    h = jnp.tanh(jnp.dot(w2_ref[...], h.astype(w2_ref.dtype),
                         preferred_element_type=jnp.float32)
                 .astype(b2_ref.dtype) + b2_ref[...])
    h = jnp.tanh(jnp.dot(w3_ref[...], h.astype(w3_ref.dtype),
                         preferred_element_type=jnp.float32)
                 .astype(b3_ref.dtype) + b3_ref[...])
    y = jnp.dot(w4_ref[...], h.astype(w4_ref.dtype),
                preferred_element_type=jnp.float32) + b4_ref[...]
    # Lane-dense, unpadded store: (out_dim, bb) with bb a multiple of 256.
    o_ref[...] = y.astype(o_ref.dtype)


def fcnn_forward(x, params, *, block_batch=4096,
                 compute_dtype=jnp.bfloat16, act_dtype=None):
    """x: (B, in_dim). params: PyTorch-layout weights w1..w4 (out_f, in_f),
    biases b1..b4 (out_f,). Returns (B, out_dim) in x.dtype.

    compute_dtype is the MXU operand dtype (bf16 default = production path;
    jnp.float32 gives exact PyTorch-f32 semantics, for correctness/debug).
    act_dtype overrides the bias-add/tanh dtype (auto: bf16 on v6e/v7x when
    compute is bf16, f32 otherwise).
    """
    out_dtype = x.dtype
    B, in_dim = x.shape
    out_dim = params["w4"].shape[0]
    assert params["w1"].shape[1] == in_dim

    cd = jnp.dtype(compute_dtype if compute_dtype is not None else x.dtype)
    kind = _device_kind()
    has_bf16_vpu = ("v6" in kind) or ("v7" in kind)   # bf16 VPU/EUP path
    multi_tc = "v7" in kind                           # 2 TensorCores / chip

    if act_dtype is None:
        ad = (jnp.dtype(jnp.bfloat16)
              if (cd == jnp.dtype(jnp.bfloat16) and has_bf16_vpu)
              else jnp.dtype(jnp.float32))
    else:
        ad = jnp.dtype(act_dtype)

    # Batch tile: multiple of 256 lanes (lane-dense everywhere, full-width MXU
    # N on v6e/v7x; 256 is also a multiple of the 128-lane minimum on v5e).
    LANE = 256
    bb = max(LANE, _round_up(min(block_batch, _round_up(B, LANE)), LANE))
    if multi_tc and B >= 2 * LANE:
        # >=2 grid steps so the "parallel" batch axis shards across both TCs.
        bb = min(bb, _round_up((B + 1) // 2, LANE))
    B_pad = _round_up(B, bb)
    grid = (B_pad // bb,)

    # Batch on the lane axis: (in_dim, B_pad).
    xt = x.T.astype(cd)
    if B_pad != B:
        xt = jnp.pad(xt, ((0, 0), (0, B_pad - B)))

    # Weights stay in PyTorch (out_features, in_features) layout -> y = W @ x.
    w1 = params["w1"].astype(cd)
    w2 = params["w2"].astype(cd)
    w3 = params["w3"].astype(cd)
    w4 = params["w4"].astype(cd)
    # Hidden biases in the activation dtype; last bias added in f32 post-acc.
    b1 = params["b1"].reshape(-1, 1).astype(ad)
    b2 = params["b2"].reshape(-1, 1).astype(ad)
    b3 = params["b3"].reshape(-1, 1).astype(ad)
    b4 = params["b4"].reshape(-1, 1).astype(jnp.float32)

    # Weights/biases: full-array blocks with constant index_maps -> fetched
    # once and VMEM-resident for every grid step (<~20 KiB total at hidden=32).
    def const_spec(shape):
        return pl.BlockSpec(shape, lambda i: (0, 0))

    in_specs = [
        pl.BlockSpec((in_dim, bb), lambda i: (0, i)),
        const_spec(w1.shape), const_spec(b1.shape),
        const_spec(w2.shape), const_spec(b2.shape),
        const_spec(w3.shape), const_spec(b3.shape),
        const_spec(w4.shape), const_spec(b4.shape),
    ]
    out_spec = pl.BlockSpec((out_dim, bb), lambda i: (0, i))

    out = pl.pallas_call(
        fcnn_kernel,
        out_shape=jax.ShapeDtypeStruct((out_dim, B_pad), out_dtype),
        grid_spec=pltpu.PrefetchScalarGridSpec(
            num_scalar_prefetch=0,
            grid=grid,
            in_specs=in_specs,
            out_specs=out_spec,
        ),
        compiler_params=pltpu.CompilerParams(
            dimension_semantics=("parallel",)),
    )(xt, w1, b1, w2, b2, w3, b3, w4, b4)

    # Drop padded batch columns (they hold tanh(bias)-chain junk), back to
    # (B, out_dim).
    return out[:, :B].T


def init_fcnn_params(key, in_dim, out_dim, hidden_dim, dtype=jnp.float32):
    """Deterministic init mimicking nn.Linear default uniform(+-1/sqrt(fan_in)).
    Weights stored in PyTorch layout (out_features, in_features)."""
    dims = [(hidden_dim, in_dim), (hidden_dim, hidden_dim),
            (hidden_dim, hidden_dim), (out_dim, hidden_dim)]
    params = {}
    for idx, (fo, fi) in enumerate(dims, start=1):
        key, kw, kb = jax.random.split(key, 3)
        bound = 1.0 / (fi ** 0.5)
        params[f"w{idx}"] = jax.random.uniform(kw, (fo, fi), dtype,
                                               minval=-bound, maxval=bound)
        params[f"b{idx}"] = jax.random.uniform(kb, (fo,), dtype,
                                               minval=-bound, maxval=bound)
    return params


def fcnn_reference(x, params):
    h = jnp.tanh(x @ params["w1"].T + params["b1"])
    h = jnp.tanh(h @ params["w2"].T + params["b2"])
    h = jnp.tanh(h @ params["w3"].T + params["b3"])
    return h @ params["w4"].T + params["b4"]


if __name__ == "__main__":
    key = jax.random.PRNGKey(0)
    batch, in_dim, out_dim, hidden_dim = 8, 4, 4, 32

    kx, kp = jax.random.split(key)
    x = jax.random.normal(kx, (batch, in_dim), dtype=jnp.float32)
    params = init_fcnn_params(kp, in_dim, out_dim, hidden_dim)
    ref = fcnn_reference(x, params)

    # (1) f32 compute path: exact PyTorch-style semantics (debug mode).
    out_f32 = jax.block_until_ready(
        fcnn_forward(x, params, compute_dtype=jnp.float32))
    assert out_f32.shape == (batch, out_dim)
    assert jnp.allclose(out_f32, ref, atol=1e-5, rtol=1e-5)

    # (2) default bf16-operand production path (f32 MXU accumulation,
    #     bf16 bias/tanh where the chip supports it): loose tolerance vs f32.
    out_bf16 = jax.block_until_ready(fcnn_forward(x, params))
    assert out_bf16.shape == (batch, out_dim)
    assert jnp.allclose(out_bf16, ref, atol=5e-2, rtol=5e-2)

    # (3) exercise batch padding + a multi-step pipelined / parallel grid.
    x2 = jax.random.normal(jax.random.fold_in(kx, 1), (600, in_dim),
                           dtype=jnp.float32)
    ref2 = fcnn_reference(x2, params)
    out2 = jax.block_until_ready(
        fcnn_forward(x2, params, block_batch=256, compute_dtype=jnp.float32))
    assert out2.shape == (600, out_dim)
    assert jnp.allclose(out2, ref2, atol=1e-5, rtol=1e-5)

    print("KERNEL_OK")
</pallas_src>

<mosaic_0001>
module attributes {stable_mosaic.version = 11 : i64} {
  func.func @fcnn_kernel(%arg0: i32, %arg1: memref<4x256xf32, #tpu.memory_space<vmem>>, %arg2: memref<32x4xf32, #tpu.memory_space<vmem>>, %arg3: memref<32x1xf32, #tpu.memory_space<vmem>>, %arg4: memref<32x32xf32, #tpu.memory_space<vmem>>, %arg5: memref<32x1xf32, #tpu.memory_space<vmem>>, %arg6: memref<32x32xf32, #tpu.memory_space<vmem>>, %arg7: memref<32x1xf32, #tpu.memory_space<vmem>>, %arg8: memref<4x32xf32, #tpu.memory_space<vmem>>, %arg9: memref<4x1xf32, #tpu.memory_space<vmem>>, %arg10: memref<4x256xf32, #tpu.memory_space<vmem>>) attributes {dimension_semantics = [#tpu.dimension_semantics<parallel>], iteration_bounds = array<i64: 1>, scalar_prefetch = 0 : i64, scratch_operands = 0 : i64, tpu.core_type = #tpu.core_type<tc>, window_params = [{transform_indices = @transform_0, window_bounds = array<i64: 4, 256>}, {pipeline_mode = #tpu.pipeline_mode<synchronous>, transform_indices = @transform_1, window_bounds = array<i64: 32, 4>}, {pipeline_mode = #tpu.pipeline_mode<synchronous>, transform_indices = @transform_2, window_bounds = array<i64: 32, 1>}, {pipeline_mode = #tpu.pipeline_mode<synchronous>, transform_indices = @transform_3, window_bounds = array<i64: 32, 32>}, {pipeline_mode = #tpu.pipeline_mode<synchronous>, transform_indices = @transform_4, window_bounds = array<i64: 32, 1>}, {pipeline_mode = #tpu.pipeline_mode<synchronous>, transform_indices = @transform_5, window_bounds = array<i64: 32, 32>}, {pipeline_mode = #tpu.pipeline_mode<synchronous>, transform_indices = @transform_6, window_bounds = array<i64: 32, 1>}, {pipeline_mode = #tpu.pipeline_mode<synchronous>, transform_indices = @transform_7, window_bounds = array<i64: 4, 32>}, {pipeline_mode = #tpu.pipeline_mode<synchronous>, transform_indices = @transform_8, window_bounds = array<i64: 4, 1>}, {transform_indices = @transform_9, window_bounds = array<i64: 4, 256>}]} {
    %c0 = arith.constant 0 : index
    %c0_0 = arith.constant 0 : index
    %0 = vector.load %arg1[%c0, %c0_0] : memref<4x256xf32, #tpu.memory_space<vmem>>, vector<4x256xf32>
    %c0_1 = arith.constant 0 : index
    %c0_2 = arith.constant 0 : index
    %1 = vector.load %arg2[%c0_1, %c0_2] : memref<32x4xf32, #tpu.memory_space<vmem>>, vector<32x4xf32>
    %cst = arith.constant dense<0.000000e+00> : vector<32x256xf32>
    %2 = tpu.matmul %1, %0, %cst {dimension_numbers = #tpu.dot_dimension_numbers<[1], [0], [0], [1], [0, 0, 1, 1], [], []>} : vector<32x4xf32>, vector<4x256xf32>, vector<32x256xf32> -> vector<32x256xf32>
    %c0_3 = arith.constant 0 : index
    %c0_4 = arith.constant 0 : index
    %3 = vector.load %arg3[%c0_3, %c0_4] : memref<32x1xf32, #tpu.memory_space<vmem>>, vector<32x1xf32>
    %4 = vector.broadcast %3 : vector<32x1xf32> to vector<32x256xf32>
    %5 = arith.addf %2, %4 : vector<32x256xf32>
    %6 = math.tanh %5 : vector<32x256xf32>
    %c0_5 = arith.constant 0 : index
    %c0_6 = arith.constant 0 : index
    %7 = vector.load %arg4[%c0_5, %c0_6] : memref<32x32xf32, #tpu.memory_space<vmem>>, vector<32x32xf32>
    %cst_7 = arith.constant dense<0.000000e+00> : vector<32x256xf32>
    %8 = tpu.matmul %7, %6, %cst_7 {dimension_numbers = #tpu.dot_dimension_numbers<[1], [0], [0], [1], [0, 0, 1, 1], [], []>} : vector<32x32xf32>, vector<32x256xf32>, vector<32x256xf32> -> vector<32x256xf32>
    %c0_8 = arith.constant 0 : index
    %c0_9 = arith.constant 0 : index
    %9 = vector.load %arg5[%c0_8, %c0_9] : memref<32x1xf32, #tpu.memory_space<vmem>>, vector<32x1xf32>
    %10 = vector.broadcast %9 : vector<32x1xf32> to vector<32x256xf32>
    %11 = arith.addf %8, %10 : vector<32x256xf32>
    %12 = math.tanh %11 : vector<32x256xf32>
    %c0_10 = arith.constant 0 : index
    %c0_11 = arith.constant 0 : index
    %13 = vector.load %arg6[%c0_10, %c0_11] : memref<32x32xf32, #tpu.memory_space<vmem>>, vector<32x32xf32>
    %cst_12 = arith.constant dense<0.000000e+00> : vector<32x256xf32>
    %14 = tpu.matmul %13, %12, %cst_12 {dimension_numbers = #tpu.dot_dimension_numbers<[1], [0], [0], [1], [0, 0, 1, 1], [], []>} : vector<32x32xf32>, vector<32x256xf32>, vector<32x256xf32> -> vector<32x256xf32>
    %c0_13 = arith.constant 0 : index
    %c0_14 = arith.constant 0 : index
    %15 = vector.load %arg7[%c0_13, %c0_14] : memref<32x1xf32, #tpu.memory_space<vmem>>, vector<32x1xf32>
    %16 = vector.broadcast %15 : vector<32x1xf32> to vector<32x256xf32>
    %17 = arith.addf %14, %16 : vector<32x256xf32>
    %18 = math.tanh %17 : vector<32x256xf32>
    %c0_15 = arith.constant 0 : index
    %c0_16 = arith.constant 0 : index
    %19 = vector.load %arg8[%c0_15, %c0_16] : memref<4x32xf32, #tpu.memory_space<vmem>>, vector<4x32xf32>
    %cst_17 = arith.constant dense<0.000000e+00> : vector<4x256xf32>
    %20 = tpu.matmul %19, %18, %cst_17 {dimension_numbers = #tpu.dot_dimension_numbers<[1], [0], [0], [1], [0, 0, 1, 1], [], []>} : vector<4x32xf32>, vector<32x256xf32>, vector<4x256xf32> -> vector<4x256xf32>
    %c0_18 = arith.constant 0 : index
    %c0_19 = arith.constant 0 : index
    %21 = vector.load %arg9[%c0_18, %c0_19] : memref<4x1xf32, #tpu.memory_space<vmem>>, vector<4x1xf32>
    %22 = vector.broadcast %21 : vector<4x1xf32> to vector<4x256xf32>
    %23 = arith.addf %20, %22 : vector<4x256xf32>
    %c0_20 = arith.constant 0 : index
    %c0_21 = arith.constant 0 : index
    %24 = vector.load %arg10[%c0_20, %c0_21] : memref<4x256xf32, #tpu.memory_space<vmem>>, vector<4x256xf32>
    tpu.vector_store %arg10[%c0_20, %c0_21], %23 {strides = array<i32>} : memref<4x256xf32, #tpu.memory_space<vmem>>, vector<4x256xf32>,
    return
  }
  func.func @transform_0(%arg0: i32) -> (i32, i32) {
    %c0_i32 = arith.constant 0 : i32
    %c0_i32_0 = arith.constant 0 : i32
    return %c0_i32, %arg0 : i32, i32
  }
  func.func @transform_1(%arg0: i32) -> (i32, i32) {
    %c0_i32 = arith.constant 0 : i32
    %c0_i32_0 = arith.constant 0 : i32
    %c0_i32_1 = arith.constant 0 : i32
    return %c0_i32, %c0_i32_0 : i32, i32
  }
  func.func @transform_2(%arg0: i32) -> (i32, i32) {
    %c0_i32 = arith.constant 0 : i32
    %c0_i32_0 = arith.constant 0 : i32
    %c0_i32_1 = arith.constant 0 : i32
    return %c0_i32, %c0_i32_0 : i32, i32
  }
  func.func @transform_3(%arg0: i32) -> (i32, i32) {
    %c0_i32 = arith.constant 0 : i32
    %c0_i32_0 = arith.constant 0 : i32
    %c0_i32_1 = arith.constant 0 : i32
    return %c0_i32, %c0_i32_0 : i32, i32
  }
  func.func @transform_4(%arg0: i32) -> (i32, i32) {
    %c0_i32 = arith.constant 0 : i32
    %c0_i32_0 = arith.constant 0 : i32
    %c0_i32_1 = arith.constant 0 : i32
    return %c0_i32, %c0_i32_0 : i32, i32
  }
  func.func @transform_5(%arg0: i32) -> (i32, i32) {
    %c0_i32 = arith.constant 0 : i32
    %c0_i32_0 = arith.constant 0 : i32
    %c0_i32_1 = arith.constant 0 : i32
    return %c0_i32, %c0_i32_0 : i32, i32
  }
  func.func @transform_6(%arg0: i32) -> (i32, i32) {
    %c0_i32 = arith.constant 0 : i32
    %c0_i32_0 = arith.constant 0 : i32
    %c0_i32_1 = arith.constant 0 : i32
    return %c0_i32, %c0_i32_0 : i32, i32
  }
  func.func @transform_7(%arg0: i32) -> (i32, i32) {
    %c0_i32 = arith.constant 0 : i32
    %c0_i32_0 = arith.constant 0 : i32
    %c0_i32_1 = arith.constant 0 : i32
    return %c0_i32, %c0_i32_0 : i32, i32
  }
  func.func @transform_8(%arg0: i32) -> (i32, i32) {
    %c0_i32 = arith.constant 0 : i32
    %c0_i32_0 = arith.constant 0 : i32
    %c0_i32_1 = arith.constant 0 : i32
    return %c0_i32, %c0_i32_0 : i32, i32
  }
  func.func @transform_9(%arg0: i32) -> (i32, i32) {
    %c0_i32 = arith.constant 0 : i32
    %c0_i32_0 = arith.constant 0 : i32
    return %c0_i32, %arg0 : i32, i32
  }
}

</mosaic_0001>

<bundles_post_ra>
// kernel: tpu_custom_call.1
= control target key start
LH: loop header
LB: loop body
LE: loop exit
PB: predicated region body
PF: predicated region fallthrough
CT: control target
= control target key end

     0   :  { %vm77_vm0 = vcmask 1043456   ;;  %v647_v2 = vmov 0.0   ;;  %vm64_vm1 = vcmask 31744   ;;  %v648_v5 = vmov 0   ;;  %s810_s0 = inlined_call_operand.vmem [shape: f32[4,256], index: 0, kind: input, shape index: {}]   ;;  %s811_s1 = inlined_call_operand.vmem [shape: f32[32,4], index: 1, kind: input, shape index: {}]   ;;  %s812_s2 = inlined_call_operand.vmem [shape: f32[32,1], index: 2, kind: input, shape index: {}]   ;;  %s813_s3 = inlined_call_operand.vmem [shape: f32[32,32], index: 3, kind: input, shape index: {}]   ;;  %s814_s4 = inlined_call_operand.vmem [shape: f32[32,1], index: 4, kind: input, shape index: {}]   ;;  %s815_s5 = inlined_call_operand.vmem [shape: f32[32,32], index: 5, kind: input, shape index: {}]   ;;  %s816_s6 = inlined_call_operand.vmem [shape: f32[32,1], index: 6, kind: input, shape index: {}]   ;;  %s817_s7 = inlined_call_operand.vmem [shape: f32[4,32], index: 7, kind: input, shape index: {}]   ;;  %s818_s8 = inlined_call_operand.vmem [shape: f32[4,1], index: 8, kind: input, shape index: {}]   ;;  %s819_s9 = inlined_call_operand.hbm [shape: f32[4,256], index: 9, kind: output, shape index: {}]  }
   0x1   :  { %v33_v0 = vld [vmem:[%s810_s0] sm:$0xff]  ;;  %158 = vmatprep.mubr.f32.mxu1 %v647_v2  ;;  %146 = vmatprep.mubr.f32.mxu0 %v647_v2  ;;  %v36_v3 = vld [vmem:[%s811_s1 + $0x10] sm:$0xff]  ;;  %v41_v6 = vld [vmem:[%s812_s2 + $0x18] sm:$0xff] }
   0x2   :  { %v63_v1 = vcombine.high %v33_v0, %v33_v0  ;;  %v34_v4 = vld [vmem:[%s811_s1] sm:$0xff]  ;;  %574 = vset.pattern.permute.xlu0 %v648_v5  ;;  %575 = vset.pattern.permute.xlu1 %v648_v5  ;;  %v39_v7 = vld [vmem:[%s812_s2 + $0x8] sm:$0xff]  ;;  %v37_v8 = vld [vmem:[%s811_s1 + $0x18] sm:$0xff] }
   0x3   :  { %v35_v9 = vld [vmem:[%s811_s1 + $0x8] sm:$0xff] }
   0x4   :  { %569 = vmatprep.subr.msk.mxu1 %vm77_vm0, %v63_v1  ;;  %554 = vmatprep.subr.msk.mxu0 %vm77_vm0, %v63_v1 }
   0x5   :  { %570 = vmatpush1.msk.msra.mxu1 %vm77_vm0, %v33_v0  ;;  %555 = vmatpush1.msk.msra.mxu0 %vm77_vm0, %v33_v0 }
   0x6   :  { %558 = vmatmul.mubr.msk.f32.vlgmr.msra.gmra.mxu1 %vm64_vm1, %v36_v3  ;;  %556 = vmatmul.mubr.msk.f32.vlgmr.msra.gmra.mxu0 %vm64_vm1, %v34_v4 }
   0x7   :  { %164 = vmatprep.mubr.f32.mxu1 %v647_v2  ;;  %152 = vmatprep.mubr.f32.mxu0 %v647_v2 }
   0x8   :  { %14 = vsyncpa [#allocation3], 0  ;;  %59 = vperm.xlu0 %574, %v41_v6   ;;  %49 = vperm.xlu1 %575, %v39_v7   ;;  %v40_v10 = vld [vmem:[%s812_s2 + $0x10] sm:$0xff]  ;;  %v38_v11 = vld [vmem:[%s812_s2] sm:$0xff]  ;;  %vm207_vm2 = vcmask 261120   ;;  %s649_s10 = smov [#allocation2]  }
   0x9   :  { %v186_v12 = vld [vmem:[%s814_s4 + $0x18] sm:$0xff]  ;;  %v185_v13 = vld [vmem:[%s814_s4 + $0x10] sm:$0xff]  ;;  %v184_v14 = vld [vmem:[%s814_s4 + $0x8] sm:$0xff]  ;;  %s546_s11 = sshll.u32 %s649_s10, 4  ;;  %s547_s11 = int_to_ptr.vmem [resolvable:$true] %s546_s11 }
   0xa   :  { %559 = vmatmul.mubr.msk.f32.gmra.mxu1 %vm64_vm1, %v37_v8  ;;  %557 = vmatmul.mubr.msk.f32.gmra.mxu0 %vm64_vm1, %v35_v9  ;;  %v183_v15 = vld [vmem:[%s814_s4] sm:$0xff]  ;;  %v324_v16 = vld [vmem:[%s816_s6 + $0x18] sm:$0xff]  ;;  %v323_v17 = vld [vmem:[%s816_s6 + $0x10] sm:$0xff]  ;;  %s625_s12 = scalar_lea.vmem %s547_s11, 128  ;;  %p630_p1 = scmp.lt.s32.totalorder %s547_s11, %s547_s11 }
   0xb   :  { %284 = vmatprep.mubr.f32.mxu1 %v647_v2  ;;  %421 = vmatprep.mubr.f32.mxu0 %v647_v2  ;;  %v322_v18 = vld [vmem:[%s816_s6 + $0x8] sm:$0xff]  ;;  %v321_v19 = vld [vmem:[%s816_s6] sm:$0xff]  ;;  %v181_v51 = vld [vmem:[%s813_s3 + $0x10] sm:$0xff]  ;;  %p626_p0 = scmp.ne.s32.totalorder %s547_s11, %s625_s12  ;;  %p631_p2 = scmp.lt.s32.totalorder %s625_s12, %s625_s12 }
   0xc   :  { %54 = vperm.xlu0 %574, %v40_v10   ;;  %44 = vperm.xlu1 %575, %v38_v11   ;;  %v455_v20 = vld [vmem:[%s818_s8] sm:$0xf]  ;;  %v180_v50 = vld [vmem:[%s813_s3 + $0x8] sm:$0xff]  ;;  %v182_v52 = vld [vmem:[%s813_s3 + $0x18] sm:$0xff] }
   0xd   :  { %v179_v48 = vld [vmem:[%s813_s3] sm:$0xff]  ;;  %p632_p3 = por %p631_p2, %p630_p1 }
   0xf   :  { %p633_p4 = pnand %p632_p3, %p626_p0 }
  0x10   :  { %204 = vperm.xlu0 %574, %v186_v12   ;;  %199 = vperm.xlu1 %575, %v185_v13  }
  0x14   :  { %194 = vperm.xlu0 %574, %v184_v14   ;;  %189 = vperm.xlu1 %575, %v183_v15  }
  0x18   :  { %342 = vperm.xlu0 %574, %v324_v16   ;;  %337 = vperm.xlu1 %575, %v323_v17   ;;  %v317_v17 = vld [vmem:[%s815_s5] sm:$0xff] }
  0x1c   :  { %332 = vperm.xlu0 %574, %v322_v18   ;;  %327 = vperm.xlu1 %575, %v321_v19   ;;  %v318_v19 = vld [vmem:[%s815_s5 + $0x8] sm:$0xff] }
  0x20   :  { %458 = vperm.xlu0 %574, %v455_v20   ;;  %v319_v20 = vld [vmem:[%s815_s5 + $0x10] sm:$0xff] }
  0x83   :  { %v60_v21 = vpop.permute.xlu0 %59  ;;  %v50_v26 = vpop.permute.xlu1 %49 }
  0x87   :  { %v55_v29 = vpop.permute.xlu0 %54  ;;  %v45_v37 = vpop.permute.xlu1 %44 }
  0x8b   :  { %v205_v58 = vpop.permute.xlu0 %204  ;;  %v200_v60 = vpop.permute.xlu1 %199 }
  0x8f   :  { %v195_v3 = vpop.permute.xlu0 %194  ;;  %v190_v6 = vpop.permute.xlu1 %189 }
  0xc6   :  { %v160_v22 = vpop.f32.mrf.mxu1  ;;  %v148_v23 = vpop.f32.mrf.mxu0 }
  0xc7   :  { %v161_v35 = vadd.f32 %v160_v22, %v55_v29  ;;  %v149_v40 = vadd.f32 %v148_v23, %v45_v37 }
  0xc8   :  { %v162_v24 = vpop.f32.mrf.mxu1  ;;  %v150_v25 = vpop.f32.mrf.mxu0 }
  0xc9   :  { %v163_v33 = vadd.f32 %v162_v24, %v55_v29  ;;  %v151_v39 = vadd.f32 %v150_v25, %v45_v37  ;;  %v338_v29 = vpop.permute.xlu1 %337 }
  0xca   :  { %v166_v27 = vpop.f32.mrf.mxu1  ;;  %v154_v28 = vpop.f32.mrf.mxu0 }
  0xcb   :  { %v167_v30 = vadd.f32 %v166_v27, %v60_v21  ;;  %v155_v38 = vadd.f32 %v154_v28, %v50_v26  ;;  %v343_v27 = vpop.permute.xlu0 %342 }
  0xcc   :  { %v168_v31 = vpop.f32.mrf.mxu1  ;;  %v156_v32 = vpop.f32.mrf.mxu0 }
  0xcd   :  { %v169_v34 = vadd.f32 %v168_v31, %v60_v21  ;;  %v157_v36 = vadd.f32 %v156_v32, %v50_v26  ;;  %v320_v21 = vld [vmem:[%s815_s5 + $0x18] sm:$0xff]  ;;  %v328_v37 = vpop.permute.xlu1 %327 }
  0xcf   :  { %577 = vtanh.f32 %v169_v34 }
  0xd0   :  { %579 = vtanh.f32 %v167_v30 }
  0xd1   :  { %581 = vtanh.f32 %v163_v33 }
  0xd2   :  { %583 = vtanh.f32 %v161_v35 }
  0xd3   :  { %585 = vtanh.f32 %v157_v36 }
  0xd4   :  { %587 = vtanh.f32 %v155_v38 }
  0xd5   :  { %589 = vtanh.f32 %v151_v39 }
  0xd6   :  { %591 = vtanh.f32 %v149_v40 }
  0xdc   :  { %v578_v41 = vpop.eup %577 }
  0xdd   :  { %v580_v42 = vpop.eup %579  ;;  %244 = vmatprep.subr.mxu1 %v578_v41 }
  0xde   :  { %v582_v43 = vpop.eup %581  ;;  %245 = vmatpush1.msra.mxu1 %v580_v42 }
  0xdf   :  { %v584_v44 = vpop.eup %583  ;;  %246 = vmatprep.subr.mxu1 %v582_v43 }
  0xe0   :  { %v586_v45 = vpop.eup %585  ;;  %247 = vmatpush1.msra.mxu1 %v584_v44 }
  0xe1   :  { %v588_v46 = vpop.eup %587  ;;  %248 = vmatprep.subr.mxu1 %v586_v45 }
  0xe2   :  { %v590_v47 = vpop.eup %589  ;;  %249 = vmatpush1.msra.mxu1 %v588_v46 }
  0xe3   :  { %v592_v49 = vpop.eup %591  ;;  %250 = vmatprep.subr.mxu1 %v590_v47 }
  0xe4   :  { %251 = vmatpush1.msra.mxu1 %v592_v49 }
  0xe5   :  { %560 = vmatmul.mubr.msk.f32.vlgmr.msra.gmra.mxu1 %vm207_vm2, %v179_v48  ;;  %v454_v48 = vld [vmem:[%s817_s7] sm:$0xf] }
  0xe6   :  { %290 = vmatprep.mubr.f32.mxu1 %v647_v2 }
  0xe9   :  { %561 = vmatmul.mubr.msk.f32.gmra.mxu1 %vm207_vm2, %v180_v50 }
  0xea   :  { %296 = vmatprep.mubr.f32.mxu1 %v647_v2 }
  0xed   :  { %562 = vmatmul.mubr.msk.f32.gmra.mxu1 %vm207_vm2, %v181_v51 }
  0xee   :  { %302 = vmatprep.mubr.f32.mxu1 %v647_v2 }
  0xf1   :  { %563 = vmatmul.mubr.msk.f32.gmra.mxu1 %vm207_vm2, %v182_v52 }
  0xf2   :  { %528 = vmatprep.mubr.f32.mxu1 %v647_v2 }
 0x1a5   :  { %v286_v53 = vpop.f32.mrf.mxu1 }
 0x1a6   :  { %v287_v9 = vadd.f32 %v286_v53, %v190_v6 }
 0x1a7   :  { %v288_v54 = vpop.f32.mrf.mxu1 }
 0x1a8   :  { %v289_v8 = vadd.f32 %v288_v54, %v190_v6 }
 0x1a9   :  { %v292_v55 = vpop.f32.mrf.mxu1 }
 0x1aa   :  { %v293_v7 = vadd.f32 %v292_v55, %v195_v3 }
 0x1ab   :  { %v294_v56 = vpop.f32.mrf.mxu1 }
 0x1ac   :  { %v295_v5 = vadd.f32 %v294_v56, %v195_v3 }
 0x1ad   :  { %v298_v57 = vpop.f32.mrf.mxu1 }
 0x1ae   :  { %v299_v4 = vadd.f32 %v298_v57, %v200_v60 }
 0x1af   :  { %v300_v59 = vpop.f32.mrf.mxu1 }
 0x1b0   :  { %v301_v0 = vadd.f32 %v300_v59, %v200_v60 }
 0x1b1   :  { %v304_v61 = vpop.f32.mrf.mxu1 }
 0x1b2   :  { %v305_v62 = vadd.f32 %v304_v61, %v205_v58 }
 0x1b3   :  { %v306_v63 = vpop.f32.mrf.mxu1 }
 0x1b4   :  { %v307_v1 = vadd.f32 %v306_v63, %v205_v58 }
 0x1b6   :  { %593 = vtanh.f32 %v307_v1 }
 0x1b7   :  { %595 = vtanh.f32 %v305_v62 }
 0x1b8   :  { %597 = vtanh.f32 %v301_v0 }
 0x1b9   :  { %599 = vtanh.f32 %v299_v4 }
 0x1ba   :  { %601 = vtanh.f32 %v295_v5 }
 0x1bb   :  { %603 = vtanh.f32 %v293_v7 }
 0x1bc   :  { %605 = vtanh.f32 %v289_v8 }
 0x1bd   :  { %607 = vtanh.f32 %v287_v9 }
 0x1c3   :  { %v594_v10 = vpop.eup %593 }
 0x1c4   :  { %v596_v11 = vpop.eup %595  ;;  %381 = vmatprep.subr.mxu0 %v594_v10 }
 0x1c5   :  { %v598_v12 = vpop.eup %597  ;;  %382 = vmatpush1.msra.mxu0 %v596_v11 }
 0x1c6   :  { %v600_v13 = vpop.eup %599  ;;  %383 = vmatprep.subr.mxu0 %v598_v12 }
 0x1c7   :  { %v602_v14 = vpop.eup %601  ;;  %384 = vmatpush1.msra.mxu0 %v600_v13 }
 0x1c8   :  { %v604_v15 = vpop.eup %603  ;;  %385 = vmatprep.subr.mxu0 %v602_v14 }
 0x1c9   :  { %v606_v16 = vpop.eup %605  ;;  %386 = vmatpush1.msra.mxu0 %v604_v15 }
 0x1ca   :  { %v608_v18 = vpop.eup %607  ;;  %387 = vmatprep.subr.mxu0 %v606_v16 }
 0x1cb   :  { %388 = vmatpush1.msra.mxu0 %v608_v18 }
 0x1cc   :  { %564 = vmatmul.mubr.msk.f32.vlgmr.msra.gmra.mxu0 %vm207_vm2, %v317_v17 }
 0x1cd   :  { %427 = vmatprep.mubr.f32.mxu0 %v647_v2 }
 0x1d0   :  { %565 = vmatmul.mubr.msk.f32.gmra.mxu0 %vm207_vm2, %v318_v19 }
 0x1d1   :  { %433 = vmatprep.mubr.f32.mxu0 %v647_v2 }
 0x1d4   :  { %566 = vmatmul.mubr.msk.f32.gmra.mxu0 %vm207_vm2, %v319_v20 }
 0x1d5   :  { %439 = vmatprep.mubr.f32.mxu0 %v647_v2  ;;  %v333_v2 = vpop.permute.xlu0 %332 }
 0x1d8   :  { %567 = vmatmul.mubr.msk.f32.gmra.mxu0 %vm207_vm2, %v320_v21 }
 0x1d9   :  { %v459_v51 = vpop.permute.xlu0 %458 }
 0x28c   :  { %v423_v22 = vpop.f32.mrf.mxu0 }
 0x28d   :  { %v424_v40 = vadd.f32 %v423_v22, %v328_v37 }
 0x28e   :  { %v425_v23 = vpop.f32.mrf.mxu0 }
 0x28f   :  { %v426_v39 = vadd.f32 %v425_v23, %v328_v37 }
 0x290   :  { %v429_v24 = vpop.f32.mrf.mxu0 }
 0x291   :  { %v430_v38 = vadd.f32 %v429_v24, %v333_v2 }
 0x292   :  { %v431_v25 = vpop.f32.mrf.mxu0 }
 0x293   :  { %v432_v36 = vadd.f32 %v431_v25, %v333_v2 }
 0x294   :  { %v435_v26 = vpop.f32.mrf.mxu0 }
 0x295   :  { %v436_v35 = vadd.f32 %v435_v26, %v338_v29 }
 0x296   :  { %v437_v28 = vpop.f32.mrf.mxu0 }
 0x297   :  { %v438_v33 = vadd.f32 %v437_v28, %v338_v29 }
 0x298   :  { %v441_v30 = vpop.f32.mrf.mxu0 }
 0x299   :  { %v442_v31 = vadd.f32 %v441_v30, %v343_v27 }
 0x29a   :  { %v443_v32 = vpop.f32.mrf.mxu0 }
 0x29b   :  { %v444_v34 = vadd.f32 %v443_v32, %v343_v27 }
 0x29d   :  { %609 = vtanh.f32 %v444_v34 }
 0x29e   :  { %611 = vtanh.f32 %v442_v31 }
 0x29f   :  { %613 = vtanh.f32 %v438_v33 }
 0x2a0   :  { %615 = vtanh.f32 %v436_v35 }
 0x2a1   :  { %617 = vtanh.f32 %v432_v36 }
 0x2a2   :  { %619 = vtanh.f32 %v430_v38 }
 0x2a3   :  { %621 = vtanh.f32 %v426_v39 }
 0x2a4   :  { %623 = vtanh.f32 %v424_v40 }
 0x2aa   :  { %v610_v41 = vpop.eup %609 }
 0x2ab   :  { %v612_v42 = vpop.eup %611  ;;  %488 = vmatprep.subr.mxu1 %v610_v41 }
 0x2ac   :  { %v614_v43 = vpop.eup %613  ;;  %489 = vmatpush1.msra.mxu1 %v612_v42 }
 0x2ad   :  { %v616_v44 = vpop.eup %615  ;;  %490 = vmatprep.subr.mxu1 %v614_v43 }
 0x2ae   :  { %v618_v45 = vpop.eup %617  ;;  %491 = vmatpush1.msra.mxu1 %v616_v44 }
 0x2af   :  { %v620_v46 = vpop.eup %619  ;;  %492 = vmatprep.subr.mxu1 %v618_v45 }
 0x2b0   :  { %v622_v47 = vpop.eup %621  ;;  %493 = vmatpush1.msra.mxu1 %v620_v46 }
 0x2b1   :  { %v624_v49 = vpop.eup %623  ;;  %494 = vmatprep.subr.mxu1 %v622_v47 }
 0x2b2   :  { %495 = vmatpush1.msra.mxu1 %v624_v49 }
 0x2b3   :  { %568 = vmatmul.mubr.msk.f32.vlgmr.msra.gmra.mxu1 %vm207_vm2, %v454_v48 }
 0x373   :  { %v530_v50 = vpop.f32.mrf.mxu1 }
 0x374   :  { %v531_v53 = vadd.f32 %v530_v50, %v459_v51 }
 0x375   :  { %v532_v52 = vpop.f32.mrf.mxu1 }
 0x376   :  { %v533_v54 = vadd.f32 %v532_v52, %v459_v51 }
 0x378   :  { %v537_v55 = vcombine.low %v531_v53, %v533_v54 }
 0x37a   :  { %539 = vst [vmem:[#allocation2] sm:$0xff] %v537_v55 }
 0x37b   :  { %636 = shalt.err (!%p633_p4)
}
 0x37c   :  { %549 = dma.vmem_to_hbm [thread:$0]  %s547_s11, 128, %s819_s9, [#allocation3]  }
 0x37d   :  { %645 = dma.done.wait [#allocation3], 128  }
 0x37e   :  { %646 = vsyncadd [#allocation3], 4294967168 }
 0x37f   :  { %553 = vsyncpa [#allocation3], 1 }

</bundles_post_ra>
